<compile_context>
chip_gen: v6e
topology: v6e:2x2x1
jax: 0.10.0
libtpu: 0.0.40
codegen_flags: <defaults>
</compile_context>

<pallas_src>
import functools
import math

import jax
import jax.numpy as jnp
from jax.experimental import pallas as pl
from jax.experimental.pallas import tpu as pltpu


# ---------------------------------------------------------------------------
# Pallas kernel: fused  (patches @ Wt + b)  with optional ReLU
# ---------------------------------------------------------------------------
def _linear_kernel(a_ref, w_ref, b_ref, o_ref, *, apply_relu):
    acc = jnp.dot(a_ref[...], w_ref[...], preferred_element_type=jnp.float32)
    acc = acc + b_ref[...]                      # (1, N) broadcasts over rows
    if apply_relu:
        acc = jnp.maximum(acc, 0.0)
    o_ref[...] = acc.astype(o_ref.dtype)


def _pallas_linear(a, w_t, b, *, apply_relu, max_tile_m=256):
    """y = maybe_relu(a @ w_t + b);  a:(M,K)  w_t:(K,N)  b:(N,)  ->  (M,N)."""
    M, K = a.shape
    Kw, N = w_t.shape
    assert K == Kw
    b2 = b.reshape(1, N).astype(jnp.float32)

    if M <= max_tile_m:
        tile_m, m_pad, a_p = M, M, a            # single block, grid of 1
    else:
        tile_m = max_tile_m                     # multiple of 8 -> aligned tiles
        m_pad = pl.cdiv(M, tile_m) * tile_m
        a_p = jnp.pad(a, ((0, m_pad - M), (0, 0))) if m_pad != M else a

    out = pl.pallas_call(
        functools.partial(_linear_kernel, apply_relu=apply_relu),
        out_shape=jax.ShapeDtypeStruct((m_pad, N), jnp.float32),
        grid_spec=pltpu.PrefetchScalarGridSpec(
            num_scalar_prefetch=0,
            grid=(m_pad // tile_m,),
            in_specs=[
                pl.BlockSpec((tile_m, K), lambda i: (i, 0)),
                pl.BlockSpec((K, N), lambda i: (0, 0)),    # weights stay resident
                pl.BlockSpec((1, N), lambda i: (0, 0)),    # bias stays resident
            ],
            out_specs=pl.BlockSpec((tile_m, N), lambda i: (i, 0)),
        ),
        compiler_params=pltpu.CompilerParams(
            dimension_semantics=("parallel",)),
    )(a_p, w_t, b2)
    return out[:M] if m_pad != M else out


# ---------------------------------------------------------------------------
# Conv1d (PyTorch NCL semantics) = im2col (wrapper) + Pallas matmul kernel
# ---------------------------------------------------------------------------
def _im2col_1d(x, kernel_size, stride, dilation):
    """x: (B, Cin, L_padded) -> patches (B*Lout, Cin*K), Lout."""
    B, Cin, Lp = x.shape
    Lo = (Lp - dilation * (kernel_size - 1) - 1) // stride + 1
    taps = []
    for k in range(kernel_size):
        start = k * dilation
        stop = start + stride * (Lo - 1) + 1
        taps.append(x[:, :, start:stop:stride])            # (B, Cin, Lo)
    p = jnp.stack(taps, axis=-1)                           # (B, Cin, Lo, K)
    p = jnp.transpose(p, (0, 2, 1, 3))                     # (B, Lo, Cin, K)
    return p.reshape(B * Lo, Cin * kernel_size), Lo


def conv1d_pallas(x, w, b, *, stride=1, padding=0, dilation=1,
                  circular=False, relu=False):
    """PyTorch-style Conv1d on (B, Cin, L) + bias (+ReLU)."""
    B, Cin, _ = x.shape
    Cout, Cin_w, K = w.shape
    assert Cin == Cin_w
    if padding > 0:
        mode = "wrap" if circular else "constant"
        x = jnp.pad(x, ((0, 0), (0, 0), (padding, padding)), mode=mode)
    patches, Lo = _im2col_1d(x, K, stride, dilation)       # (B*Lo, Cin*K)
    w_t = w.reshape(Cout, Cin * K).T                       # (Cin*K, Cout)
    y = _pallas_linear(patches, w_t, b, apply_relu=relu)   # (B*Lo, Cout)
    return jnp.transpose(y.reshape(B, Lo, Cout), (0, 2, 1))  # (B, Cout, Lo)


# ---------------------------------------------------------------------------
# Module configuration (mirrors BasicConv1dEncoder.__init__)
# ---------------------------------------------------------------------------
def _temporal_layer_configs(num_input_time_steps, latent_node_state_dim):
    """Per layer: (kernel, stride, padding, dilation, circular, relu_after)."""
    T, d = num_input_time_steps, latent_node_state_dim
    if d == 56:
        k1 = 10
        k2 = T // k1 - d + (1 - d % 2)
        return [(k1, k1, 0, 1, False, True), (k2, 1, 0, 1, False, False)]
    if d == 504:
        k1 = 3
        k2 = T // k1 - d + (1 - d % 2)
        return [(k1, k1, 0, 1, False, True), (k2, 1, 0, 1, False, False)]
    if d == 514:
        k1, k2 = 101, 61
        return [(k1, 1, 50, 1, True, True),
                (k1, 1, 52, 10, True, True),
                (k2, 2, 0, 1, True, False)]
    if T == 1001:
        k1 = 9
        k2 = T // 2 - (1 - T % 2)
        return [(k1, 1, 4, 1, True, True),
                (k2, 1, k2 // 2 - 1, 1, True, False)]
    k1 = 10
    k2 = T // 10 // 2
    return [(k1, k1, k1, 1, True, True), (k2, 1, 2, 1, False, False)]


def _conv_init(key, cout, cin, k):
    kw, kb = jax.random.split(key)
    bound = 1.0 / math.sqrt(cin * k)
    w = jax.random.uniform(kw, (cout, cin, k), jnp.float32, -bound, bound)
    b = jax.random.uniform(kb, (cout,), jnp.float32, -bound, bound)
    return w, b


def init_params(key, num_input_time_steps, num_channels, latent_node_state_dim):
    T, C = num_input_time_steps, num_channels
    spatial_kernel = C + (1 - C % 2)
    cfgs = _temporal_layer_configs(T, latent_node_state_dim)
    keys = jax.random.split(key, len(cfgs) + 1)
    return {
        "spatial": _conv_init(keys[0], T, T, spatial_kernel),
        "temporal": [_conv_init(keys[i + 1], C, C, cfg[0])
                     for i, cfg in enumerate(cfgs)],
    }


# ---------------------------------------------------------------------------
# Forward pass (Pallas) and pure-JAX reference
# ---------------------------------------------------------------------------
def basic_conv1d_encoder_forward(params, x, *, num_input_time_steps,
                                 num_channels, latent_node_state_dim):
    B, C, T = x.shape
    assert C == num_channels and T == num_input_time_steps

    # Spatial conv: length axis = channel axis, circular pad C//2, + ReLU.
    w_s, b_s = params["spatial"]
    xt = jnp.transpose(x, (0, 2, 1))                        # (B, T, C)
    y = conv1d_pallas(xt, w_s, b_s, stride=1, padding=C // 2,
                      circular=True, relu=True)             # (B, T, C)
    x_cur = jnp.transpose(y, (0, 2, 1))                     # (B, C, T)

    # Temporal conv stack.
    cfgs = _temporal_layer_configs(T, latent_node_state_dim)
    for (w, b), (_, stride, pad, dil, circ, relu) in zip(params["temporal"], cfgs):
        x_cur = conv1d_pallas(x_cur, w, b, stride=stride, padding=pad,
                              dilation=dil, circular=circ, relu=relu)

    return x_cur.reshape(B, num_channels, -1)               # x.view(B, C, -1)


def _conv1d_ref(x, w, b, *, stride, padding, dilation, circular):
    if circular and padding > 0:
        x = jnp.pad(x, ((0, 0), (0, 0), (padding, padding)), mode="wrap")
        pad_cfg = [(0, 0)]
    else:
        pad_cfg = [(padding, padding)]
    y = jax.lax.conv_general_dilated(
        x, w, window_strides=(stride,), padding=pad_cfg,
        rhs_dilation=(dilation,), dimension_numbers=("NCH", "OIH", "NCH"),
        precision=jax.lax.Precision.HIGHEST)
    return y + b[None, :, None]


def forward_ref(params, x, *, num_input_time_steps, num_channels,
                latent_node_state_dim):
    B, C, T = x.shape
    w_s, b_s = params["spatial"]
    xt = jnp.transpose(x, (0, 2, 1))
    y = jax.nn.relu(_conv1d_ref(xt, w_s, b_s, stride=1, padding=C // 2,
                                dilation=1, circular=True))
    x_cur = jnp.transpose(y, (0, 2, 1))
    for (w, b), (_, stride, pad, dil, circ, relu) in zip(
            params["temporal"],
            _temporal_layer_configs(T, latent_node_state_dim)):
        x_cur = _conv1d_ref(x_cur, w, b, stride=stride, padding=pad,
                            dilation=dil, circular=circ)
        if relu:
            x_cur = jax.nn.relu(x_cur)
    return x_cur.reshape(B, num_channels, -1)


if __name__ == "__main__":
    # Small config hitting the default ("else") temporal branch of the module.
    B = 2
    num_channels = 4
    num_input_time_steps = 160
    latent_node_state_dim = 32

    key = jax.random.PRNGKey(0)
    k_params, k_x = jax.random.split(key)
    params = init_params(k_params, num_input_time_steps, num_channels,
                         latent_node_state_dim)
    x = jax.random.normal(k_x, (B, num_channels, num_input_time_steps),
                          dtype=jnp.float32)

    fwd = jax.jit(functools.partial(
        basic_conv1d_encoder_forward,
        num_input_time_steps=num_input_time_steps,
        num_channels=num_channels,
        latent_node_state_dim=latent_node_state_dim))
    out = jax.block_until_ready(fwd(params, x))

    ref = forward_ref(params, x,
                      num_input_time_steps=num_input_time_steps,
                      num_channels=num_channels,
                      latent_node_state_dim=latent_node_state_dim)

    # Expected lengths: spatial conv preserves C; temporal: 160 -> 18 -> 15.
    assert out.shape == (B, num_channels, 15), out.shape
    assert ref.shape == out.shape, (ref.shape, out.shape)
    # Tolerance covers possible MXU pass-reduction of f32 matmuls vs XLA conv.
    assert jnp.allclose(out, ref, rtol=5e-3, atol=5e-3), \
        float(jnp.max(jnp.abs(out - ref)))
    print("KERNEL_OK")
</pallas_src>

<mosaic_0001>
module attributes {stable_mosaic.version = 11 : i64} {
  func.func @_linear_kernel(%arg0: i32, %arg1: memref<8x800xf32, #tpu.memory_space<vmem>>, %arg2: memref<800x160xf32, #tpu.memory_space<vmem>>, %arg3: memref<1x160xf32, #tpu.memory_space<vmem>>, %arg4: memref<8x160xf32, #tpu.memory_space<vmem>>) attributes {dimension_semantics = [#tpu.dimension_semantics<parallel>], iteration_bounds = array<i64: 1>, scalar_prefetch = 0 : i64, scratch_operands = 0 : i64, tpu.core_type = #tpu.core_type<tc>, window_params = [{transform_indices = @transform_0, window_bounds = array<i64: 8, 800>}, {pipeline_mode = #tpu.pipeline_mode<synchronous>, transform_indices = @transform_1, window_bounds = array<i64: 800, 160>}, {pipeline_mode = #tpu.pipeline_mode<synchronous>, transform_indices = @transform_2, window_bounds = array<i64: 1, 160>}, {transform_indices = @transform_3, window_bounds = array<i64: 8, 160>}]} {
    %c0 = arith.constant 0 : index
    %c0_0 = arith.constant 0 : index
    %0 = vector.load %arg1[%c0, %c0_0] : memref<8x800xf32, #tpu.memory_space<vmem>>, vector<8x800xf32>
    %c0_1 = arith.constant 0 : index
    %c0_2 = arith.constant 0 : index
    %1 = vector.load %arg2[%c0_1, %c0_2] : memref<800x160xf32, #tpu.memory_space<vmem>>, vector<800x160xf32>
    %cst = arith.constant dense<0.000000e+00> : vector<8x160xf32>
    %2 = tpu.matmul %0, %1, %cst {dimension_numbers = #tpu.dot_dimension_numbers<[1], [0], [0], [1], [0, 0, 1, 1], [], []>} : vector<8x800xf32>, vector<800x160xf32>, vector<8x160xf32> -> vector<8x160xf32>
    %c0_3 = arith.constant 0 : index
    %c0_4 = arith.constant 0 : index
    %3 = vector.load %arg3[%c0_3, %c0_4] : memref<1x160xf32, #tpu.memory_space<vmem>>, vector<1x160xf32>
    %4 = vector.broadcast %3 : vector<1x160xf32> to vector<8x160xf32>
    %5 = arith.addf %2, %4 : vector<8x160xf32>
    %cst_5 = arith.constant 0.000000e+00 : f32
    %6 = vector.broadcast %cst_5 : f32 to vector<8x160xf32>
    %7 = arith.maximumf %5, %6 : vector<8x160xf32>
    %c0_6 = arith.constant 0 : index
    %c0_7 = arith.constant 0 : index
    %8 = vector.load %arg4[%c0_6, %c0_7] : memref<8x160xf32, #tpu.memory_space<vmem>>, vector<8x160xf32>
    tpu.vector_store %arg4[%c0_6, %c0_7], %7 {strides = array<i32>} : memref<8x160xf32, #tpu.memory_space<vmem>>, vector<8x160xf32>,
    return
  }
  func.func @transform_0(%arg0: i32) -> (i32, i32) {
    %c0_i32 = arith.constant 0 : i32
    %c0_i32_0 = arith.constant 0 : i32
    return %arg0, %c0_i32 : i32, i32
  }
  func.func @transform_1(%arg0: i32) -> (i32, i32) {
    %c0_i32 = arith.constant 0 : i32
    %c0_i32_0 = arith.constant 0 : i32
    %c0_i32_1 = arith.constant 0 : i32
    return %c0_i32, %c0_i32_0 : i32, i32
  }
  func.func @transform_2(%arg0: i32) -> (i32, i32) {
    %c0_i32 = arith.constant 0 : i32
    %c0_i32_0 = arith.constant 0 : i32
    %c0_i32_1 = arith.constant 0 : i32
    return %c0_i32, %c0_i32_0 : i32, i32
  }
  func.func @transform_3(%arg0: i32) -> (i32, i32) {
    %c0_i32 = arith.constant 0 : i32
    %c0_i32_0 = arith.constant 0 : i32
    return %arg0, %c0_i32 : i32, i32
  }
}

module attributes {stable_mosaic.version = 11 : i64} {
  func.func @_linear_kernel(%arg0: i32, %arg1: memref<36x40xf32, #tpu.memory_space<vmem>>, %arg2: memref<40x4xf32, #tpu.memory_space<vmem>>, %arg3: memref<1x4xf32, #tpu.memory_space<vmem>>, %arg4: memref<36x4xf32, #tpu.memory_space<vmem>>) attributes {dimension_semantics = [#tpu.dimension_semantics<parallel>], iteration_bounds = array<i64: 1>, scalar_prefetch = 0 : i64, scratch_operands = 0 : i64, tpu.core_type = #tpu.core_type<tc>, window_params = [{transform_indices = @transform_0, window_bounds = array<i64: 36, 40>}, {pipeline_mode = #tpu.pipeline_mode<synchronous>, transform_indices = @transform_1, window_bounds = array<i64: 40, 4>}, {pipeline_mode = #tpu.pipeline_mode<synchronous>, transform_indices = @transform_2, window_bounds = array<i64: 1, 4>}, {transform_indices = @transform_3, window_bounds = array<i64: 36, 4>}]} {
    %c0 = arith.constant 0 : index
    %c0_0 = arith.constant 0 : index
    %0 = vector.load %arg1[%c0, %c0_0] : memref<36x40xf32, #tpu.memory_space<vmem>>, vector<36x40xf32>
    %c0_1 = arith.constant 0 : index
    %c0_2 = arith.constant 0 : index
    %1 = vector.load %arg2[%c0_1, %c0_2] : memref<40x4xf32, #tpu.memory_space<vmem>>, vector<40x4xf32>
    %cst = arith.constant dense<0.000000e+00> : vector<36x4xf32>
    %2 = tpu.matmul %0, %1, %cst {dimension_numbers = #tpu.dot_dimension_numbers<[1], [0], [0], [1], [0, 0, 1, 1], [], []>} : vector<36x40xf32>, vector<40x4xf32>, vector<36x4xf32> -> vector<36x4xf32>
    %c0_3 = arith.constant 0 : index
    %c0_4 = arith.constant 0 : index
    %3 = vector.load %arg3[%c0_3, %c0_4] : memref<1x4xf32, #tpu.memory_space<vmem>>, vector<1x4xf32>
    %4 = vector.broadcast %3 : vector<1x4xf32> to vector<36x4xf32>
    %5 = arith.addf %2, %4 : vector<36x4xf32>
    %cst_5 = arith.constant 0.000000e+00 : f32
    %6 = vector.broadcast %cst_5 : f32 to vector<36x4xf32>
    %7 = arith.maximumf %5, %6 : vector<36x4xf32>
    %c0_6 = arith.constant 0 : index
    %c0_7 = arith.constant 0 : index
    %8 = vector.load %arg4[%c0_6, %c0_7] : memref<36x4xf32, #tpu.memory_space<vmem>>, vector<36x4xf32>
    tpu.vector_store %arg4[%c0_6, %c0_7], %7 {strides = array<i32>} : memref<36x4xf32, #tpu.memory_space<vmem>>, vector<36x4xf32>,
    return
  }
  func.func @transform_0(%arg0: i32) -> (i32, i32) {
    %c0_i32 = arith.constant 0 : i32
    %c0_i32_0 = arith.constant 0 : i32
    return %arg0, %c0_i32 : i32, i32
  }
  func.func @transform_1(%arg0: i32) -> (i32, i32) {
    %c0_i32 = arith.constant 0 : i32
    %c0_i32_0 = arith.constant 0 : i32
    %c0_i32_1 = arith.constant 0 : i32
    return %c0_i32, %c0_i32_0 : i32, i32
  }
  func.func @transform_2(%arg0: i32) -> (i32, i32) {
    %c0_i32 = arith.constant 0 : i32
    %c0_i32_0 = arith.constant 0 : i32
    %c0_i32_1 = arith.constant 0 : i32
    return %c0_i32, %c0_i32_0 : i32, i32
  }
  func.func @transform_3(%arg0: i32) -> (i32, i32) {
    %c0_i32 = arith.constant 0 : i32
    %c0_i32_0 = arith.constant 0 : i32
    return %arg0, %c0_i32 : i32, i32
  }
}

module attributes {stable_mosaic.version = 11 : i64} {
  func.func @_linear_kernel(%arg0: i32, %arg1: memref<30x32xf32, #tpu.memory_space<vmem>>, %arg2: memref<32x4xf32, #tpu.memory_space<vmem>>, %arg3: memref<1x4xf32, #tpu.memory_space<vmem>>, %arg4: memref<30x4xf32, #tpu.memory_space<vmem>>) attributes {dimension_semantics = [#tpu.dimension_semantics<parallel>], iteration_bounds = array<i64: 1>, scalar_prefetch = 0 : i64, scratch_operands = 0 : i64, tpu.core_type = #tpu.core_type<tc>, window_params = [{transform_indices = @transform_0, window_bounds = array<i64: 30, 32>}, {pipeline_mode = #tpu.pipeline_mode<synchronous>, transform_indices = @transform_1, window_bounds = array<i64: 32, 4>}, {pipeline_mode = #tpu.pipeline_mode<synchronous>, transform_indices = @transform_2, window_bounds = array<i64: 1, 4>}, {transform_indices = @transform_3, window_bounds = array<i64: 30, 4>}]} {
    %c0 = arith.constant 0 : index
    %c0_0 = arith.constant 0 : index
    %0 = vector.load %arg1[%c0, %c0_0] : memref<30x32xf32, #tpu.memory_space<vmem>>, vector<30x32xf32>
    %c0_1 = arith.constant 0 : index
    %c0_2 = arith.constant 0 : index
    %1 = vector.load %arg2[%c0_1, %c0_2] : memref<32x4xf32, #tpu.memory_space<vmem>>, vector<32x4xf32>
    %cst = arith.constant dense<0.000000e+00> : vector<30x4xf32>
    %2 = tpu.matmul %0, %1, %cst {dimension_numbers = #tpu.dot_dimension_numbers<[1], [0], [0], [1], [0, 0, 1, 1], [], []>} : vector<30x32xf32>, vector<32x4xf32>, vector<30x4xf32> -> vector<30x4xf32>
    %c0_3 = arith.constant 0 : index
    %c0_4 = arith.constant 0 : index
    %3 = vector.load %arg3[%c0_3, %c0_4] : memref<1x4xf32, #tpu.memory_space<vmem>>, vector<1x4xf32>
    %4 = vector.broadcast %3 : vector<1x4xf32> to vector<30x4xf32>
    %5 = arith.addf %2, %4 : vector<30x4xf32>
    %c0_5 = arith.constant 0 : index
    %c0_6 = arith.constant 0 : index
    %6 = vector.load %arg4[%c0_5, %c0_6] : memref<30x4xf32, #tpu.memory_space<vmem>>, vector<30x4xf32>
    tpu.vector_store %arg4[%c0_5, %c0_6], %5 {strides = array<i32>} : memref<30x4xf32, #tpu.memory_space<vmem>>, vector<30x4xf32>,
    return
  }
  func.func @transform_0(%arg0: i32) -> (i32, i32) {
    %c0_i32 = arith.constant 0 : i32
    %c0_i32_0 = arith.constant 0 : i32
    return %arg0, %c0_i32 : i32, i32
  }
  func.func @transform_1(%arg0: i32) -> (i32, i32) {
    %c0_i32 = arith.constant 0 : i32
    %c0_i32_0 = arith.constant 0 : i32
    %c0_i32_1 = arith.constant 0 : i32
    return %c0_i32, %c0_i32_0 : i32, i32
  }
  func.func @transform_2(%arg0: i32) -> (i32, i32) {
    %c0_i32 = arith.constant 0 : i32
    %c0_i32_0 = arith.constant 0 : i32
    %c0_i32_1 = arith.constant 0 : i32
    return %c0_i32, %c0_i32_0 : i32, i32
  }
  func.func @transform_3(%arg0: i32) -> (i32, i32) {
    %c0_i32 = arith.constant 0 : i32
    %c0_i32_0 = arith.constant 0 : i32
    return %arg0, %c0_i32 : i32, i32
  }
}

</mosaic_0001>

<bundles_post_ra>
// kernel: basic_conv1d_encoder_forward.3
= control target key start
LH: loop header
LB: loop body
LE: loop exit
PB: predicated region body
PF: predicated region fallthrough
CT: control target
= control target key end

     0   :  { %vm233_vm0 = vcmask 261120   ;;  %s1184_s1 = inlined_call_operand.vmem [shape: f32[800,160], index: 1, kind: input, shape index: {}]   ;;  %s1185_s0 = inlined_call_operand.vmem [shape: f32[8,800], index: 0, kind: input, shape index: {}]   ;;  %s1186_s2 = inlined_call_operand.vmem [shape: f32[1,160], index: 2, kind: input, shape index: {}]   ;;  %s1187_s3 = inlined_call_operand.vmem [shape: f32[8,160], index: 3, kind: output, shape index: {}]  }
   0x1   :  { %v52_v0 = vld [vmem:[%s1184_s1 + $0xf8] sm:$0xff]  ;;  %v51_v1 = vld [vmem:[%s1184_s1 + $0xf0] sm:$0xff]  ;;  %v50_v2 = vld [vmem:[%s1184_s1 + $0xe8] sm:$0xff] }
   0x2   :  { %237 = vmatprep.subr.mxu0 %v52_v0  ;;  %v116_v3 = vld [vmem:[%s1184_s1 + $0x2f8] sm:$0xff]  ;;  %v49_v4 = vld [vmem:[%s1184_s1 + $0xe0] sm:$0xff]  ;;  %v115_v5 = vld [vmem:[%s1184_s1 + $0x2f0] sm:$0xff] }
   0x3   :  { %238 = vmatpush1.msra.mxu0 %v51_v1  ;;  %308 = vmatprep.subr.mxu1 %v116_v3  ;;  %v48_v6 = vld [vmem:[%s1184_s1 + $0xd8] sm:$0xff]  ;;  %v114_v7 = vld [vmem:[%s1184_s1 + $0x2e8] sm:$0xff]  ;;  %v47_v8 = vld [vmem:[%s1184_s1 + $0xd0] sm:$0xff] }
   0x4   :  { %239 = vmatprep.subr.mxu0 %v50_v2  ;;  %309 = vmatpush1.msra.mxu1 %v115_v5  ;;  %v113_v9 = vld [vmem:[%s1184_s1 + $0x2e0] sm:$0xff]  ;;  %v112_v10 = vld [vmem:[%s1184_s1 + $0x2d8] sm:$0xff]  ;;  %v46_v11 = vld [vmem:[%s1184_s1 + $0xc8] sm:$0xff] }
   0x5   :  { %240 = vmatpush1.msra.mxu0 %v49_v4  ;;  %310 = vmatprep.subr.mxu1 %v114_v7  ;;  %v111_v12 = vld [vmem:[%s1184_s1 + $0x2d0] sm:$0xff]  ;;  %v45_v13 = vld [vmem:[%s1184_s1 + $0xc0] sm:$0xff]  ;;  %v110_v14 = vld [vmem:[%s1184_s1 + $0x2c8] sm:$0xff] }
   0x6   :  { %241 = vmatprep.subr.mxu0 %v48_v6  ;;  %311 = vmatpush1.msra.mxu1 %v113_v9  ;;  %v44_v15 = vld [vmem:[%s1184_s1 + $0xb8] sm:$0xff]  ;;  %v109_v16 = vld [vmem:[%s1184_s1 + $0x2c0] sm:$0xff]  ;;  %v43_v17 = vld [vmem:[%s1184_s1 + $0xb0] sm:$0xff] }
   0x7   :  { %242 = vmatpush1.msra.mxu0 %v47_v8  ;;  %312 = vmatprep.subr.mxu1 %v112_v10  ;;  %v108_v18 = vld [vmem:[%s1184_s1 + $0x2b8] sm:$0xff]  ;;  %v42_v19 = vld [vmem:[%s1184_s1 + $0xa8] sm:$0xff]  ;;  %v107_v20 = vld [vmem:[%s1184_s1 + $0x2b0] sm:$0xff] }
   0x8   :  { %243 = vmatprep.subr.mxu0 %v46_v11  ;;  %313 = vmatpush1.msra.mxu1 %v111_v12  ;;  %v41_v21 = vld [vmem:[%s1184_s1 + $0xa0] sm:$0xff]  ;;  %v106_v22 = vld [vmem:[%s1184_s1 + $0x2a8] sm:$0xff]  ;;  %v40_v23 = vld [vmem:[%s1184_s1 + $0x98] sm:$0xff] }
   0x9   :  { %244 = vmatpush1.msra.mxu0 %v45_v13  ;;  %314 = vmatprep.subr.mxu1 %v110_v14  ;;  %v105_v24 = vld [vmem:[%s1184_s1 + $0x2a0] sm:$0xff]  ;;  %v39_v25 = vld [vmem:[%s1184_s1 + $0x90] sm:$0xff]  ;;  %v104_v26 = vld [vmem:[%s1184_s1 + $0x298] sm:$0xff] }
   0xa   :  { %245 = vmatprep.subr.mxu0 %v44_v15  ;;  %315 = vmatpush1.msra.mxu1 %v109_v16  ;;  %v38_v27 = vld [vmem:[%s1184_s1 + $0x88] sm:$0xff]  ;;  %v103_v28 = vld [vmem:[%s1184_s1 + $0x290] sm:$0xff]  ;;  %v37_v29 = vld [vmem:[%s1184_s1 + $0x80] sm:$0xff] }
   0xb   :  { %246 = vmatpush1.msra.mxu0 %v43_v17  ;;  %316 = vmatprep.subr.mxu1 %v108_v18  ;;  %v102_v30 = vld [vmem:[%s1184_s1 + $0x288] sm:$0xff]  ;;  %v36_v31 = vld [vmem:[%s1184_s1 + $0x78] sm:$0xff]  ;;  %v101_v32 = vld [vmem:[%s1184_s1 + $0x280] sm:$0xff] }
   0xc   :  { %247 = vmatprep.subr.mxu0 %v42_v19  ;;  %317 = vmatpush1.msra.mxu1 %v107_v20  ;;  %v35_v33 = vld [vmem:[%s1184_s1 + $0x70] sm:$0xff]  ;;  %v100_v34 = vld [vmem:[%s1184_s1 + $0x278] sm:$0xff]  ;;  %v34_v35 = vld [vmem:[%s1184_s1 + $0x68] sm:$0xff] }
   0xd   :  { %248 = vmatpush1.msra.mxu0 %v41_v21  ;;  %318 = vmatprep.subr.mxu1 %v106_v22  ;;  %v99_v36 = vld [vmem:[%s1184_s1 + $0x270] sm:$0xff]  ;;  %v33_v37 = vld [vmem:[%s1184_s1 + $0x60] sm:$0xff]  ;;  %v98_v38 = vld [vmem:[%s1184_s1 + $0x268] sm:$0xff] }
   0xe   :  { %249 = vmatprep.subr.mxu0 %v40_v23  ;;  %319 = vmatpush1.msra.mxu1 %v105_v24  ;;  %v32_v39 = vld [vmem:[%s1184_s1 + $0x58] sm:$0xff]  ;;  %v97_v40 = vld [vmem:[%s1184_s1 + $0x260] sm:$0xff]  ;;  %v31_v41 = vld [vmem:[%s1184_s1 + $0x50] sm:$0xff] }
   0xf   :  { %250 = vmatpush1.msra.mxu0 %v39_v25  ;;  %320 = vmatprep.subr.mxu1 %v104_v26  ;;  %v96_v42 = vld [vmem:[%s1184_s1 + $0x258] sm:$0xff]  ;;  %v30_v43 = vld [vmem:[%s1184_s1 + $0x48] sm:$0xff]  ;;  %v95_v44 = vld [vmem:[%s1184_s1 + $0x250] sm:$0xff] }
  0x10   :  { %251 = vmatprep.subr.mxu0 %v38_v27  ;;  %321 = vmatpush1.msra.mxu1 %v103_v28  ;;  %v29_v45 = vld [vmem:[%s1184_s1 + $0x40] sm:$0xff]  ;;  %v94_v46 = vld [vmem:[%s1184_s1 + $0x248] sm:$0xff]  ;;  %v28_v47 = vld [vmem:[%s1184_s1 + $0x38] sm:$0xff] }
  0x11   :  { %252 = vmatpush1.msra.mxu0 %v37_v29  ;;  %322 = vmatprep.subr.mxu1 %v102_v30  ;;  %v93_v48 = vld [vmem:[%s1184_s1 + $0x240] sm:$0xff]  ;;  %v27_v49 = vld [vmem:[%s1184_s1 + $0x30] sm:$0xff]  ;;  %v92_v50 = vld [vmem:[%s1184_s1 + $0x238] sm:$0xff] }
  0x12   :  { %253 = vmatprep.subr.mxu0 %v36_v31  ;;  %323 = vmatpush1.msra.mxu1 %v101_v32  ;;  %v26_v51 = vld [vmem:[%s1184_s1 + $0x28] sm:$0xff]  ;;  %v91_v52 = vld [vmem:[%s1184_s1 + $0x230] sm:$0xff]  ;;  %v25_v53 = vld [vmem:[%s1184_s1 + $0x20] sm:$0xff] }
  0x13   :  { %254 = vmatpush1.msra.mxu0 %v35_v33  ;;  %324 = vmatprep.subr.mxu1 %v100_v34  ;;  %v90_v54 = vld [vmem:[%s1184_s1 + $0x228] sm:$0xff]  ;;  %v24_v55 = vld [vmem:[%s1184_s1 + $0x18] sm:$0xff]  ;;  %v89_v56 = vld [vmem:[%s1184_s1 + $0x220] sm:$0xff] }
  0x14   :  { %255 = vmatprep.subr.mxu0 %v34_v35  ;;  %325 = vmatpush1.msra.mxu1 %v99_v36  ;;  %v23_v57 = vld [vmem:[%s1184_s1 + $0x10] sm:$0xff]  ;;  %v88_v58 = vld [vmem:[%s1184_s1 + $0x218] sm:$0xff]  ;;  %v22_v59 = vld [vmem:[%s1184_s1 + $0x8] sm:$0xff] }
  0x15   :  { %256 = vmatpush1.msra.mxu0 %v33_v37  ;;  %326 = vmatprep.subr.mxu1 %v98_v38  ;;  %v87_v60 = vld [vmem:[%s1184_s1 + $0x210] sm:$0xff]  ;;  %v21_v61 = vld [vmem:[%s1184_s1] sm:$0xff]  ;;  %v86_v62 = vld [vmem:[%s1184_s1 + $0x208] sm:$0xff] }
  0x16   :  { %257 = vmatprep.subr.mxu0 %v32_v39  ;;  %327 = vmatpush1.msra.mxu1 %v97_v40  ;;  %v84_v63 = vld [vmem:[%s1184_s1 + $0x1f8] sm:$0xff]  ;;  %v85_v0 = vld [vmem:[%s1184_s1 + $0x200] sm:$0xff]  ;;  %v83_v1 = vld [vmem:[%s1184_s1 + $0x1f0] sm:$0xff] }
  0x17   :  { %258 = vmatpush1.msra.mxu0 %v31_v41  ;;  %328 = vmatprep.subr.mxu1 %v96_v42  ;;  %v148_v2 = vld [vmem:[%s1184_s1 + $0x3f8] sm:$0xff]  ;;  %v82_v3 = vld [vmem:[%s1184_s1 + $0x1e8] sm:$0xff]  ;;  %v147_v4 = vld [vmem:[%s1184_s1 + $0x3f0] sm:$0xff] }
  0x18   :  { %259 = vmatprep.subr.mxu0 %v30_v43  ;;  %329 = vmatpush1.msra.mxu1 %v95_v44  ;;  %v81_v5 = vld [vmem:[%s1184_s1 + $0x1e0] sm:$0xff]  ;;  %v146_v6 = vld [vmem:[%s1184_s1 + $0x3e8] sm:$0xff]  ;;  %v80_v7 = vld [vmem:[%s1184_s1 + $0x1d8] sm:$0xff] }
  0x19   :  { %260 = vmatpush1.msra.mxu0 %v29_v45  ;;  %330 = vmatprep.subr.mxu1 %v94_v46  ;;  %v145_v8 = vld [vmem:[%s1184_s1 + $0x3e0] sm:$0xff]  ;;  %v79_v9 = vld [vmem:[%s1184_s1 + $0x1d0] sm:$0xff]  ;;  %v144_v10 = vld [vmem:[%s1184_s1 + $0x3d8] sm:$0xff] }
  0x1a   :  { %261 = vmatprep.subr.mxu0 %v28_v47  ;;  %331 = vmatpush1.msra.mxu1 %v93_v48  ;;  %v78_v11 = vld [vmem:[%s1184_s1 + $0x1c8] sm:$0xff]  ;;  %v143_v12 = vld [vmem:[%s1184_s1 + $0x3d0] sm:$0xff]  ;;  %v77_v13 = vld [vmem:[%s1184_s1 + $0x1c0] sm:$0xff] }
  0x1b   :  { %262 = vmatpush1.msra.mxu0 %v27_v49  ;;  %332 = vmatprep.subr.mxu1 %v92_v50  ;;  %v142_v14 = vld [vmem:[%s1184_s1 + $0x3c8] sm:$0xff]  ;;  %v76_v15 = vld [vmem:[%s1184_s1 + $0x1b8] sm:$0xff]  ;;  %v141_v16 = vld [vmem:[%s1184_s1 + $0x3c0] sm:$0xff] }
  0x1c   :  { %263 = vmatprep.subr.mxu0 %v26_v51  ;;  %333 = vmatpush1.msra.mxu1 %v91_v52  ;;  %v75_v17 = vld [vmem:[%s1184_s1 + $0x1b0] sm:$0xff]  ;;  %v140_v18 = vld [vmem:[%s1184_s1 + $0x3b8] sm:$0xff]  ;;  %v74_v19 = vld [vmem:[%s1184_s1 + $0x1a8] sm:$0xff] }
  0x1d   :  { %264 = vmatpush1.msra.mxu0 %v25_v53  ;;  %334 = vmatprep.subr.mxu1 %v90_v54  ;;  %v139_v20 = vld [vmem:[%s1184_s1 + $0x3b0] sm:$0xff]  ;;  %v73_v21 = vld [vmem:[%s1184_s1 + $0x1a0] sm:$0xff]  ;;  %v138_v22 = vld [vmem:[%s1184_s1 + $0x3a8] sm:$0xff] }
  0x1e   :  { %265 = vmatprep.subr.mxu0 %v24_v55  ;;  %335 = vmatpush1.msra.mxu1 %v89_v56  ;;  %v72_v23 = vld [vmem:[%s1184_s1 + $0x198] sm:$0xff]  ;;  %v137_v24 = vld [vmem:[%s1184_s1 + $0x3a0] sm:$0xff]  ;;  %v71_v25 = vld [vmem:[%s1184_s1 + $0x190] sm:$0xff] }
  0x1f   :  { %266 = vmatpush1.msra.mxu0 %v23_v57  ;;  %336 = vmatprep.subr.mxu1 %v88_v58  ;;  %v136_v26 = vld [vmem:[%s1184_s1 + $0x398] sm:$0xff]  ;;  %v70_v27 = vld [vmem:[%s1184_s1 + $0x188] sm:$0xff]  ;;  %v135_v28 = vld [vmem:[%s1184_s1 + $0x390] sm:$0xff] }
  0x20   :  { %267 = vmatprep.subr.mxu0 %v22_v59  ;;  %337 = vmatpush1.msra.mxu1 %v87_v60  ;;  %v69_v29 = vld [vmem:[%s1184_s1 + $0x180] sm:$0xff]  ;;  %v134_v30 = vld [vmem:[%s1184_s1 + $0x388] sm:$0xff]  ;;  %v68_v31 = vld [vmem:[%s1184_s1 + $0x178] sm:$0xff] }
  0x21   :  { %268 = vmatpush1.msra.mxu0 %v21_v61  ;;  %338 = vmatprep.subr.mxu1 %v86_v62  ;;  %v133_v32 = vld [vmem:[%s1184_s1 + $0x380] sm:$0xff]  ;;  %v67_v33 = vld [vmem:[%s1184_s1 + $0x170] sm:$0xff]  ;;  %v132_v34 = vld [vmem:[%s1184_s1 + $0x378] sm:$0xff] }
  0x22   :  { %269 = vmatprep.subr.mxu0 %v84_v63  ;;  %339 = vmatpush1.msra.mxu1 %v85_v0  ;;  %v66_v35 = vld [vmem:[%s1184_s1 + $0x168] sm:$0xff]  ;;  %v131_v36 = vld [vmem:[%s1184_s1 + $0x370] sm:$0xff]  ;;  %v65_v37 = vld [vmem:[%s1184_s1 + $0x160] sm:$0xff] }
  0x23   :  { %270 = vmatpush2.msra.mxu0 %v83_v1  ;;  %340 = vmatprep.subr.mxu1 %v148_v2  ;;  %v130_v38 = vld [vmem:[%s1184_s1 + $0x368] sm:$0xff]  ;;  %v64_v39 = vld [vmem:[%s1184_s1 + $0x158] sm:$0xff]  ;;  %v129_v40 = vld [vmem:[%s1184_s1 + $0x360] sm:$0xff] }
  0x24   :  { %271 = vmatprep.subr.mxu0 %v82_v3  ;;  %341 = vmatpush2.msra.mxu1 %v147_v4  ;;  %v63_v41 = vld [vmem:[%s1184_s1 + $0x150] sm:$0xff]  ;;  %v128_v42 = vld [vmem:[%s1184_s1 + $0x358] sm:$0xff]  ;;  %v62_v43 = vld [vmem:[%s1184_s1 + $0x148] sm:$0xff] }
  0x25   :  { %272 = vmatpush2.msra.mxu0 %v81_v5  ;;  %342 = vmatprep.subr.mxu1 %v146_v6  ;;  %v127_v44 = vld [vmem:[%s1184_s1 + $0x350] sm:$0xff]  ;;  %v61_v45 = vld [vmem:[%s1184_s1 + $0x140] sm:$0xff]  ;;  %v126_v46 = vld [vmem:[%s1184_s1 + $0x348] sm:$0xff] }
  0x26   :  { %273 = vmatprep.subr.mxu0 %v80_v7  ;;  %343 = vmatpush2.msra.mxu1 %v145_v8  ;;  %v60_v47 = vld [vmem:[%s1184_s1 + $0x138] sm:$0xff]  ;;  %v125_v48 = vld [vmem:[%s1184_s1 + $0x340] sm:$0xff]  ;;  %v59_v49 = vld [vmem:[%s1184_s1 + $0x130] sm:$0xff] }
  0x27   :  { %274 = vmatpush2.msra.mxu0 %v79_v9  ;;  %344 = vmatprep.subr.mxu1 %v144_v10  ;;  %v124_v50 = vld [vmem:[%s1184_s1 + $0x338] sm:$0xff]  ;;  %v58_v51 = vld [vmem:[%s1184_s1 + $0x128] sm:$0xff]  ;;  %v123_v52 = vld [vmem:[%s1184_s1 + $0x330] sm:$0xff] }
  0x28   :  { %275 = vmatprep.subr.mxu0 %v78_v11  ;;  %345 = vmatpush2.msra.mxu1 %v143_v12  ;;  %v57_v53 = vld [vmem:[%s1184_s1 + $0x120] sm:$0xff]  ;;  %v122_v54 = vld [vmem:[%s1184_s1 + $0x328] sm:$0xff]  ;;  %v56_v55 = vld [vmem:[%s1184_s1 + $0x118] sm:$0xff] }
  0x29   :  { %276 = vmatpush2.msra.mxu0 %v77_v13  ;;  %346 = vmatprep.subr.mxu1 %v142_v14  ;;  %v121_v56 = vld [vmem:[%s1184_s1 + $0x320] sm:$0xff]  ;;  %v55_v57 = vld [vmem:[%s1184_s1 + $0x110] sm:$0xff]  ;;  %v120_v58 = vld [vmem:[%s1184_s1 + $0x318] sm:$0xff] }
  0x2a   :  { %277 = vmatprep.subr.mxu0 %v76_v15  ;;  %347 = vmatpush2.msra.mxu1 %v141_v16  ;;  %v54_v59 = vld [vmem:[%s1184_s1 + $0x108] sm:$0xff]  ;;  %v53_v61 = vld [vmem:[%s1184_s1 + $0x100] sm:$0xff]  ;;  %v119_v62 = vld [vmem:[%s1184_s1 + $0x310] sm:$0xff] }
  0x2b   :  { %278 = vmatpush2.msra.mxu0 %v75_v17  ;;  %348 = vmatprep.subr.mxu1 %v140_v18  ;;  %v15_v60 = vld [vmem:[%s1185_s0 + $0x8] sm:$0xff]  ;;  %v14_v63 = vld [vmem:[%s1185_s0] sm:$0xff]  ;;  %v180_v1 = vld [vmem:[%s1184_s1 + $0x4f8] sm:$0xff] }
  0x2c   :  { %279 = vmatprep.subr.mxu0 %v74_v19  ;;  %349 = vmatpush2.msra.mxu1 %v139_v20  ;;  %v118_v0 = vld [vmem:[%s1184_s1 + $0x308] sm:$0xff]  ;;  %v117_v2 = vld [vmem:[%s1184_s1 + $0x300] sm:$0xff]  ;;  %v17_v3 = vld [vmem:[%s1185_s0 + $0x18] sm:$0xff] }
  0x2d   :  { %280 = vmatpush2.msra.mxu0 %v73_v21  ;;  %350 = vmatprep.subr.mxu1 %v138_v22  ;;  %v179_v4 = vld [vmem:[%s1184_s1 + $0x4f0] sm:$0xff]  ;;  %v178_v6 = vld [vmem:[%s1184_s1 + $0x4e8] sm:$0xff]  ;;  %v177_v7 = vld [vmem:[%s1184_s1 + $0x4e0] sm:$0xff] }
  0x2e   :  { %281 = vmatprep.subr.mxu0 %v72_v23  ;;  %351 = vmatpush2.msra.mxu1 %v137_v24  ;;  %v16_v5 = vld [vmem:[%s1185_s0 + $0x10] sm:$0xff]  ;;  %v220_v8 = vld [vmem:[%s1184_s1 + $0x638] sm:$0xff]  ;;  %v218_v12 = vld [vmem:[%s1184_s1 + $0x628] sm:$0xff] }
  0x2f   :  { %282 = vmatpush2.msra.mxu0 %v71_v25  ;;  %352 = vmatprep.subr.mxu1 %v136_v26  ;;  %v176_v9 = vld [vmem:[%s1184_s1 + $0x4d8] sm:$0xff]  ;;  %v219_v10 = vld [vmem:[%s1184_s1 + $0x630] sm:$0xff]  ;;  %v174_v13 = vld [vmem:[%s1184_s1 + $0x4c8] sm:$0xff] }
  0x30   :  { %283 = vmatprep.subr.mxu0 %v70_v27  ;;  %353 = vmatpush2.msra.mxu1 %v135_v28  ;;  %v175_v11 = vld [vmem:[%s1184_s1 + $0x4d0] sm:$0xff]  ;;  %v217_v14 = vld [vmem:[%s1184_s1 + $0x620] sm:$0xff]  ;;  %v216_v16 = vld [vmem:[%s1184_s1 + $0x618] sm:$0xff] }
  0x31   :  { %284 = vmatpush2.msra.mxu0 %v69_v29  ;;  %354 = vmatprep.subr.mxu1 %v134_v30  ;;  %v173_v15 = vld [vmem:[%s1184_s1 + $0x4c0] sm:$0xff]  ;;  %v172_v17 = vld [vmem:[%s1184_s1 + $0x4b8] sm:$0xff]  ;;  %v215_v18 = vld [vmem:[%s1184_s1 + $0x610] sm:$0xff]  ;;  %v531_v30 = vmov 0.0  }
  0x32   :  { %285 = vmatprep.subr.mxu0 %v68_v31  ;;  %355 = vmatpush2.msra.mxu1 %v133_v32  ;;  %v171_v19 = vld [vmem:[%s1184_s1 + $0x4b0] sm:$0xff]  ;;  %v214_v20 = vld [vmem:[%s1184_s1 + $0x608] sm:$0xff]  ;;  %v169_v23 = vld [vmem:[%s1184_s1 + $0x4a0] sm:$0xff] }
  0x33   :  { %286 = vmatpush2.msra.mxu0 %v67_v33  ;;  %356 = vmatprep.subr.mxu1 %v132_v34  ;;  %v170_v21 = vld [vmem:[%s1184_s1 + $0x4a8] sm:$0xff]  ;;  %v213_v24 = vld [vmem:[%s1184_s1 + $0x600] sm:$0xff]  ;;  %v168_v25 = vld [vmem:[%s1184_s1 + $0x498] sm:$0xff] }
  0x34   :  { %287 = vmatprep.subr.mxu0 %v66_v35  ;;  %357 = vmatpush2.msra.mxu1 %v131_v36  ;;  %v19_v22 = vld [vmem:[%s1185_s0 + $0x28] sm:$0xff]  ;;  %v167_v26 = vld [vmem:[%s1184_s1 + $0x490] sm:$0xff]  ;;  %v165_v29 = vld [vmem:[%s1184_s1 + $0x480] sm:$0xff] }
  0x35   :  { %288 = vmatpush2.msra.mxu0 %v65_v37  ;;  %358 = vmatprep.subr.mxu1 %v130_v38  ;;  %v20_v27 = vld [vmem:[%s1185_s0 + $0x30] sm:$0xff]  ;;  %v166_v28 = vld [vmem:[%s1184_s1 + $0x488] sm:$0xff]  ;;  %v164_v31 = vld [vmem:[%s1184_s1 + $0x478] sm:$0xff] }
  0x36   :  { %289 = vmatprep.subr.mxu0 %v64_v39  ;;  %359 = vmatpush2.msra.mxu1 %v129_v40  ;;  %v163_v32 = vld [vmem:[%s1184_s1 + $0x470] sm:$0xff]  ;;  %v162_v33 = vld [vmem:[%s1184_s1 + $0x468] sm:$0xff]  ;;  %v161_v34 = vld [vmem:[%s1184_s1 + $0x460] sm:$0xff] }
  0x37   :  { %290 = vmatpush2.msra.mxu0 %v63_v41  ;;  %360 = vmatprep.subr.mxu1 %v128_v42  ;;  %v160_v35 = vld [vmem:[%s1184_s1 + $0x458] sm:$0xff]  ;;  %v159_v36 = vld [vmem:[%s1184_s1 + $0x450] sm:$0xff]  ;;  %v158_v37 = vld [vmem:[%s1184_s1 + $0x448] sm:$0xff] }
  0x38   :  { %291 = vmatprep.subr.mxu0 %v62_v43  ;;  %361 = vmatpush2.msra.mxu1 %v127_v44  ;;  %v157_v38 = vld [vmem:[%s1184_s1 + $0x440] sm:$0xff]  ;;  %v156_v39 = vld [vmem:[%s1184_s1 + $0x438] sm:$0xff]  ;;  %v155_v40 = vld [vmem:[%s1184_s1 + $0x430] sm:$0xff] }
  0x39   :  { %292 = vmatpush2.msra.mxu0 %v61_v45  ;;  %362 = vmatprep.subr.mxu1 %v126_v46  ;;  %v154_v41 = vld [vmem:[%s1184_s1 + $0x428] sm:$0xff]  ;;  %v153_v42 = vld [vmem:[%s1184_s1 + $0x420] sm:$0xff]  ;;  %v152_v43 = vld [vmem:[%s1184_s1 + $0x418] sm:$0xff] }
  0x3a   :  { %293 = vmatprep.subr.mxu0 %v60_v47  ;;  %363 = vmatpush2.msra.mxu1 %v125_v48  ;;  %v151_v44 = vld [vmem:[%s1184_s1 + $0x410] sm:$0xff]  ;;  %v150_v45 = vld [vmem:[%s1184_s1 + $0x408] sm:$0xff]  ;;  %v149_v46 = vld [vmem:[%s1184_s1 + $0x400] sm:$0xff] }
  0x3b   :  { %294 = vmatpush2.msra.mxu0 %v59_v49  ;;  %364 = vmatprep.subr.mxu1 %v124_v50  ;;  %v212_v47 = vld [vmem:[%s1184_s1 + $0x5f8] sm:$0xff]  ;;  %v211_v48 = vld [vmem:[%s1184_s1 + $0x5f0] sm:$0xff]  ;;  %v210_v49 = vld [vmem:[%s1184_s1 + $0x5e8] sm:$0xff] }
  0x3c   :  { %295 = vmatprep.subr.mxu0 %v58_v51  ;;  %365 = vmatpush2.msra.mxu1 %v123_v52  ;;  %v209_v50 = vld [vmem:[%s1184_s1 + $0x5e0] sm:$0xff]  ;;  %v208_v51 = vld [vmem:[%s1184_s1 + $0x5d8] sm:$0xff]  ;;  %v207_v52 = vld [vmem:[%s1184_s1 + $0x5d0] sm:$0xff] }
  0x3d   :  { %296 = vmatpush2.msra.mxu0 %v57_v53  ;;  %366 = vmatprep.subr.mxu1 %v122_v54  ;;  %v206_v53 = vld [vmem:[%s1184_s1 + $0x5c8] sm:$0xff]  ;;  %v205_v54 = vld [vmem:[%s1184_s1 + $0x5c0] sm:$0xff] }
  0x3e   :  { %297 = vmatprep.subr.mxu0 %v56_v55  ;;  %367 = vmatpush2.msra.mxu1 %v121_v56  ;;  %v204_v55 = vld [vmem:[%s1184_s1 + $0x5b8] sm:$0xff]  ;;  %v203_v56 = vld [vmem:[%s1184_s1 + $0x5b0] sm:$0xff] }
  0x3f   :  { %298 = vmatpush2.msra.mxu0 %v55_v57  ;;  %368 = vmatprep.subr.mxu1 %v120_v58  ;;  %v202_v57 = vld [vmem:[%s1184_s1 + $0x5a8] sm:$0xff]  ;;  %v201_v58 = vld [vmem:[%s1184_s1 + $0x5a0] sm:$0xff] }
  0x40   :  { %299 = vmatprep.subr.mxu0 %v54_v59  ;;  %301 = vmatprep.mubr.f32.mxu0 %v15_v60  ;;  %v200_v59 = vld [vmem:[%s1184_s1 + $0x598] sm:$0xff]  ;;  %v199_v60 = vld [vmem:[%s1184_s1 + $0x590] sm:$0xff] }
  0x41   :  { %300 = vmatpush2.msra.mxu0 %v53_v61  ;;  %369 = vmatpush2.msra.mxu1 %v119_v62  ;;  %v198_v61 = vld [vmem:[%s1184_s1 + $0x588] sm:$0xff]  ;;  %v197_v62 = vld [vmem:[%s1184_s1 + $0x580] sm:$0xff] }
  0x42   :  { %302 = vmatmul.mubr.f32.vlgmr.msra.gmra.mxu0 %v14_v63  ;;  %370 = vmatprep.subr.mxu1 %v118_v0  ;;  %v196_v63 = vld [vmem:[%s1184_s1 + $0x578] sm:$0xff]  ;;  %v195_v0 = vld [vmem:[%s1184_s1 + $0x570] sm:$0xff] }
  0x43   :  { %379 = vmatprep.subr.mxu0 %v180_v1  ;;  %371 = vmatpush2.msra.mxu1 %v117_v2  ;;  %v194_v1 = vld [vmem:[%s1184_s1 + $0x568] sm:$0xff]  ;;  %v193_v2 = vld [vmem:[%s1184_s1 + $0x560] sm:$0xff] }
  0x44   :  { %372 = vmatprep.mubr.f32.mxu1 %v17_v3  ;;  %380 = vmatpush1.msra.mxu0 %v179_v4  ;;  %v192_v3 = vld [vmem:[%s1184_s1 + $0x558] sm:$0xff]  ;;  %v191_v4 = vld [vmem:[%s1184_s1 + $0x550] sm:$0xff] }
  0x45   :  { %373 = vmatmul.mubr.f32.vlgmr.msra.gmra.mxu1 %v16_v5  ;;  %381 = vmatprep.subr.mxu0 %v178_v6  ;;  %v190_v5 = vld [vmem:[%s1184_s1 + $0x548] sm:$0xff]  ;;  %v189_v6 = vld [vmem:[%s1184_s1 + $0x540] sm:$0xff] }
  0x46   :  { %382 = vmatpush1.msra.mxu0 %v177_v7  ;;  %474 = vmatprep.subr.mxu1 %v220_v8  ;;  %v188_v7 = vld [vmem:[%s1184_s1 + $0x538] sm:$0xff]  ;;  %v187_v8 = vld [vmem:[%s1184_s1 + $0x530] sm:$0xff] }
  0x47   :  { %383 = vmatprep.subr.mxu0 %v176_v9  ;;  %475 = vmatpush1.msra.mxu1 %v219_v10  ;;  %v186_v9 = vld [vmem:[%s1184_s1 + $0x528] sm:$0xff]  ;;  %v185_v10 = vld [vmem:[%s1184_s1 + $0x520] sm:$0xff] }
  0x48   :  { %384 = vmatpush1.msra.mxu0 %v175_v11  ;;  %476 = vmatprep.subr.mxu1 %v218_v12  ;;  %v184_v11 = vld [vmem:[%s1184_s1 + $0x518] sm:$0xff]  ;;  %v183_v12 = vld [vmem:[%s1184_s1 + $0x510] sm:$0xff] }
  0x49   :  { %385 = vmatprep.subr.mxu0 %v174_v13  ;;  %477 = vmatpush1.msra.mxu1 %v217_v14  ;;  %v182_v13 = vld [vmem:[%s1184_s1 + $0x508] sm:$0xff]  ;;  %v181_v14 = vld [vmem:[%s1184_s1 + $0x500] sm:$0xff] }
  0x4a   :  { %386 = vmatpush1.msra.mxu0 %v173_v15  ;;  %478 = vmatprep.subr.mxu1 %v216_v16  ;;  %v18_v15 = vld [vmem:[%s1185_s0 + $0x20] sm:$0xff]  ;;  %v223_v16 = vlaneseq }
  0x4b   :  { %387 = vmatprep.subr.mxu0 %v172_v17  ;;  %479 = vmatpush1.msra.mxu1 %v215_v18 }
  0x4c   :  { %388 = vmatpush1.msra.mxu0 %v171_v19  ;;  %480 = vmatprep.subr.mxu1 %v214_v20  ;;  %v224_v17 = vshrl.u32 %v223_v16, 7  ;;  %v221_v19 = vld [vmem:[%s1186_s2] sm:$0x3] }
  0x4d   :  { %389 = vmatprep.subr.mxu0 %v170_v21  ;;  %443 = vmatprep.mubr.f32.mxu0 %v19_v22 }
  0x4e   :  { %390 = vmatpush1.msra.mxu0 %v169_v23  ;;  %481 = vmatpush1.msra.mxu1 %v213_v24  ;;  %v225_v18 = vsub.s32 0, %v224_v17  ;;  %v229_v20 = vsub.s32 1, %v224_v17 }
  0x4f   :  { %391 = vmatprep.subr.mxu0 %v168_v25  ;;  %514 = vmatprep.mubr.f32.mxu1 %v531_v30 }
  0x50   :  { %392 = vmatpush1.msra.mxu0 %v167_v26  ;;  %529 = vmatmul.mubr.msk.f32.vlgmr.msra.gmra.mxu1 %vm233_vm0, %v20_v27  ;;  %v226_v22 = vrot.slane %v221_v19, %v225_v18  ;;  %v230_v23 = vrot.slane %v221_v19, %v229_v20 }
  0x51   :  { %393 = vmatprep.subr.mxu0 %v166_v28 }
  0x52   :  { %394 = vmatpush1.msra.mxu0 %v165_v29 }
  0x53   :  { %395 = vmatprep.subr.mxu0 %v164_v31 }
  0x54   :  { %396 = vmatpush1.msra.mxu0 %v163_v32 }
  0x55   :  { %397 = vmatprep.subr.mxu0 %v162_v33 }
  0x56   :  { %398 = vmatpush1.msra.mxu0 %v161_v34 }
  0x57   :  { %399 = vmatprep.subr.mxu0 %v160_v35 }
  0x58   :  { %400 = vmatpush1.msra.mxu0 %v159_v36 }
  0x59   :  { %401 = vmatprep.subr.mxu0 %v158_v37 }
  0x5a   :  { %402 = vmatpush1.msra.mxu0 %v157_v38 }
  0x5b   :  { %403 = vmatprep.subr.mxu0 %v156_v39 }
  0x5c   :  { %404 = vmatpush1.msra.mxu0 %v155_v40 }
  0x5d   :  { %405 = vmatprep.subr.mxu0 %v154_v41 }
  0x5e   :  { %406 = vmatpush1.msra.mxu0 %v153_v42 }
  0x5f   :  { %407 = vmatprep.subr.mxu0 %v152_v43 }
  0x60   :  { %408 = vmatpush1.msra.mxu0 %v151_v44 }
  0x61   :  { %409 = vmatprep.subr.mxu0 %v150_v45 }
  0x62   :  { %410 = vmatpush1.msra.mxu0 %v149_v46 }
  0x63   :  { %411 = vmatprep.subr.mxu0 %v212_v47 }
  0x64   :  { %412 = vmatpush2.msra.mxu0 %v211_v48 }
  0x65   :  { %413 = vmatprep.subr.mxu0 %v210_v49 }
  0x66   :  { %414 = vmatpush2.msra.mxu0 %v209_v50 }
  0x67   :  { %415 = vmatprep.subr.mxu0 %v208_v51 }
  0x68   :  { %416 = vmatpush2.msra.mxu0 %v207_v52 }
  0x69   :  { %417 = vmatprep.subr.mxu0 %v206_v53 }
  0x6a   :  { %418 = vmatpush2.msra.mxu0 %v205_v54 }
  0x6b   :  { %419 = vmatprep.subr.mxu0 %v204_v55 }
  0x6c   :  { %420 = vmatpush2.msra.mxu0 %v203_v56 }
  0x6d   :  { %421 = vmatprep.subr.mxu0 %v202_v57 }
  0x6e   :  { %422 = vmatpush2.msra.mxu0 %v201_v58 }
  0x6f   :  { %423 = vmatprep.subr.mxu0 %v200_v59 }
  0x70   :  { %424 = vmatpush2.msra.mxu0 %v199_v60 }
  0x71   :  { %425 = vmatprep.subr.mxu0 %v198_v61 }
  0x72   :  { %426 = vmatpush2.msra.mxu0 %v197_v62 }
  0x73   :  { %427 = vmatprep.subr.mxu0 %v196_v63 }
  0x74   :  { %428 = vmatpush2.msra.mxu0 %v195_v0 }
  0x75   :  { %429 = vmatprep.subr.mxu0 %v194_v1 }
  0x76   :  { %430 = vmatpush2.msra.mxu0 %v193_v2 }
  0x77   :  { %431 = vmatprep.subr.mxu0 %v192_v3 }
  0x78   :  { %432 = vmatpush2.msra.mxu0 %v191_v4 }
  0x79   :  { %433 = vmatprep.subr.mxu0 %v190_v5 }
  0x7a   :  { %434 = vmatpush2.msra.mxu0 %v189_v6 }
  0x7b   :  { %435 = vmatprep.subr.mxu0 %v188_v7 }
  0x7c   :  { %436 = vmatpush2.msra.mxu0 %v187_v8 }
  0x7d   :  { %437 = vmatprep.subr.mxu0 %v186_v9 }
  0x7e   :  { %438 = vmatpush2.msra.mxu0 %v185_v10 }
  0x7f   :  { %439 = vmatprep.subr.mxu0 %v184_v11 }
  0x80   :  { %440 = vmatpush2.msra.mxu0 %v183_v12 }
  0x81   :  { %441 = vmatprep.subr.mxu0 %v182_v13 }
  0x82   :  { %442 = vmatpush2.msra.mxu0 %v181_v14 }
  0x83   :  { %444 = vmatmul.mubr.f32.vlgmr.msra.gmra.mxu0 %v18_v15 }
 0x102   :  { %v303_v21 = vpop.f32.mrf.mxu0 }
 0x103   :  { %v304_v26 = vadd.f32 %v303_v21, %v226_v22 }
 0x104   :  { %v305_v24 = vpop.f32.mrf.mxu0 }
 0x105   :  { %v374_v25 = vpop.f32.mrf.mxu1  ;;  %v306_v27 = vadd.f32 %v305_v24, %v230_v23 }
 0x106   :  { %v375_v29 = vadd.f32 %v374_v25, %v304_v26 }
 0x107   :  { %v376_v28 = vpop.f32.mrf.mxu1 }
 0x108   :  { %v377_v32 = vadd.f32 %v376_v28, %v306_v27 }
 0x110   :  { %v516_v31 = vpop.f32.mrf.mxu1 }
 0x112   :  { %v518_v37 = vpop.f32.mrf.mxu1 }
 0x143   :  { %v445_v30 = vpop.f32.mrf.mxu0 }
 0x144   :  { %v446_v33 = vadd.f32 %v445_v30, %v375_v29 }
 0x145   :  { %v447_v34 = vpop.f32.mrf.mxu0 }
 0x146   :  { %v517_v35 = vadd.f32 %v516_v31, %v446_v33  ;;  %v448_v36 = vadd.f32 %v447_v34, %v377_v32 }
 0x148   :  { %v521_v38 = vmax.f32 %v517_v35, 0.0  ;;  %v519_v39 = vadd.f32 %v518_v37, %v448_v36 }
 0x14a   :  { %523 = vst [vmem:[%s1187_s3] sm:$0xff] %v521_v38  ;;  %v522_v40 = vmax.f32 %v519_v39, 0.0 }
 0x14c   :  { %524 = vst.msk [vmem:[%s1187_s3 + $0x8] sm:$0xff] %vm233_vm0, %v522_v40 }

// kernel: basic_conv1d_encoder_forward.4
= control target key start
LH: loop header
LB: loop body
LE: loop exit
PB: predicated region body
PF: predicated region fallthrough
CT: control target
= control target key end

     0   :  { %v206_v0 = vmov 0.0   ;;  %vm31_vm0 = vcmask 326656   ;;  %vm207_vm1 = vmmov 0   ;;  %vm142_vm2 = vcmask 31744   ;;  %s285_s1 = inlined_call_operand.vmem [shape: f32[40,4], index: 1, kind: input, shape index: {}]   ;;  %s286_s0 = inlined_call_operand.vmem [shape: f32[36,40], index: 0, kind: input, shape index: {}]   ;;  %s287_s2 = inlined_call_operand.vmem [shape: f32[1,4], index: 2, kind: input, shape index: {}]   ;;  %s288_s3 = inlined_call_operand.vmem [shape: f32[36,4], index: 3, kind: output, shape index: {}]  }
   0x1   :  { %169 = vmatprep.subr.mxu0 %v206_v0  ;;  %v23_v1 = vld [vmem:[%s285_s1 + $0x20] sm:$0xff]  ;;  %194 = vmatprep.subr.mxu1 %v206_v0  ;;  %v22_v2 = vld [vmem:[%s285_s1 + $0x18] sm:$0xff]  ;;  %v21_v3 = vld [vmem:[%s285_s1 + $0x10] sm:$0xff]  ;;  %vm147_vm3 = vcmask 27648  }
   0x2   :  { %170 = vmatpush3.msra.mxu0 %v23_v1  ;;  %199 = vmatpush3.msra.mxu1 %v23_v1  ;;  %v20_v4 = vld [vmem:[%s285_s1 + $0x8] sm:$0xff]  ;;  %v19_v5 = vld [vmem:[%s285_s1] sm:$0xff]  ;;  %v17_v7 = vld [vmem:[%s286_s0 + $0x18] sm:$0xff] }
   0x3   :  { %171 = vmatprep.subr.mxu0 %v206_v0  ;;  %195 = vmatprep.subr.mxu1 %v206_v0  ;;  %v14_v6 = vld [vmem:[%s286_s0] sm:$0xff]  ;;  %v15_v8 = vld [vmem:[%s286_s0 + $0x8] sm:$0xff]  ;;  %v16_v10 = vld [vmem:[%s286_s0 + $0x10] sm:$0xff] }
   0x4   :  { %172 = vmatpush3.msra.mxu0 %v22_v2  ;;  %200 = vmatpush3.msra.mxu1 %v22_v2  ;;  %v18_v9 = vld [vmem:[%s286_s0 + $0x20] sm:$0xf] }
   0x5   :  { %173 = vmatprep.subr.mxu0 %v206_v0  ;;  %196 = vmatprep.subr.mxu1 %v206_v0  ;;  %v153_v11 = vld [vmem:[%s287_s2] ss:$0 sm:$0xff] }
   0x6   :  { %174 = vmatpush3.msra.mxu0 %v21_v3  ;;  %201 = vmatpush3.msra.mxu1 %v21_v3 }
   0x7   :  { %175 = vmatprep.subr.mxu0 %v206_v0  ;;  %197 = vmatprep.subr.mxu1 %v206_v0 }
   0x8   :  { %176 = vmatpush3.msra.mxu0 %v20_v4  ;;  %202 = vmatpush3.msra.mxu1 %v20_v4 }
   0x9   :  { %177 = vmatprep.subr.mxu0 %v206_v0  ;;  %179 = vmatprep.mubr.msk.f32.mxu0 %vm207_vm1, %v206_v0 }
   0xa   :  { %178 = vmatpush3.msra.mxu0 %v19_v5  ;;  %198 = vmatprep.subr.mxu1 %v206_v0 }
   0xb   :  { %180 = vmatmul.mubr.msk.f32.vlgmr.msra.gmra.mxu0 %vm31_vm0, %v14_v6  ;;  %203 = vmatpush3.msra.mxu1 %v19_v5 }
   0xc   :  { %188 = vmatprep.mubr.msk.f32.mxu1 %vm207_vm1, %v206_v0  ;;  %182 = vmatprep.mubr.msk.f32.mxu0 %vm207_vm1, %v206_v0 }
   0xd   :  { %189 = vmatmul.mubr.msk.f32.vlgmr.msra.gmra.mxu1 %vm31_vm0, %v17_v7 }
   0xe   :  { %191 = vmatprep.mubr.msk.f32.mxu1 %vm207_vm1, %v206_v0 }
   0xf   :  { %183 = vmatmul.mubr.msk.f32.gmra.mxu0 %vm31_vm0, %v15_v8 }
  0x10   :  { %185 = vmatprep.mubr.msk.f32.mxu0 %vm207_vm1, %v206_v0 }
  0x11   :  { %192 = vmatmul.mubr.msk.f32.gmra.mxu1 %vm31_vm0, %v18_v9 }
  0x13   :  { %186 = vmatmul.mubr.msk.f32.gmra.mxu0 %vm31_vm0, %v16_v10 }
  0xcb   :  { %v113_v12 = vpop.f32.mrf.mxu0 }
  0xcc   :  { %v114_v13 = vadd.f32 %v153_v11, %v113_v12 }
  0xcd   :  { %v181_v14 = vpop.f32.mrf.mxu0  ;;  %v128_v15 = vpop.f32.mrf.mxu1 }
  0xce   :  { %v137_v16 = vmax.f32 %v114_v13, 0.0  ;;  %v129_v17 = vadd.f32 %v153_v11, %v128_v15 }
  0xcf   :  { %v118_v18 = vpop.f32.mrf.mxu0  ;;  %v190_v19 = vpop.f32.mrf.mxu1 }
  0xd0   :  { %143 = vst.msk [vmem:[%s288_s3] sm:$0xff] %vm142_vm2, %v137_v16  ;;  %v140_v20 = vmax.f32 %v129_v17, 0.0  ;;  %v119_v21 = vadd.f32 %v153_v11, %v118_v18 }
  0xd1   :  { %v184_v22 = vpop.f32.mrf.mxu0  ;;  %v133_v23 = vpop.f32.mrf.mxu1 }
  0xd2   :  { %146 = vst.msk [vmem:[%s288_s3 + $0x18] sm:$0xff] %vm142_vm2, %v140_v20  ;;  %v138_v24 = vmax.f32 %v119_v21, 0.0  ;;  %v134_v25 = vadd.f32 %v153_v11, %v133_v23 }
  0xd3   :  { %v123_v26 = vpop.f32.mrf.mxu0  ;;  %v193_v27 = vpop.f32.mrf.mxu1 }
  0xd4   :  { %144 = vst.msk [vmem:[%s288_s3 + $0x8] sm:$0xff] %vm142_vm2, %v138_v24  ;;  %v141_v28 = vmax.f32 %v134_v25, 0.0  ;;  %v124_v29 = vadd.f32 %v153_v11, %v123_v26 }
  0xd5   :  { %v187_v30 = vpop.f32.mrf.mxu0 }
  0xd6   :  { %148 = vst.msk [vmem:[%s288_s3 + $0x20] sm:$0xf] %vm147_vm3, %v141_v28  ;;  %v139_v31 = vmax.f32 %v124_v29, 0.0 }
  0xd8   :  { %145 = vst.msk [vmem:[%s288_s3 + $0x10] sm:$0xff] %vm142_vm2, %v139_v31 }

// kernel: basic_conv1d_encoder_forward.5
= control target key start
LH: loop header
LB: loop body
LE: loop exit
PB: predicated region body
PF: predicated region fallthrough
CT: control target
= control target key end

     0   :  { %vm29_vm0 = vcmask 261120   ;;  %vm127_vm1 = vcmask 31744   ;;  %vm131_vm2 = vcmask 29696   ;;  %s231_s1 = inlined_call_operand.vmem [shape: f32[32,4], index: 1, kind: input, shape index: {}]   ;;  %s232_s0 = inlined_call_operand.vmem [shape: f32[30,32], index: 0, kind: input, shape index: {}]   ;;  %s233_s2 = inlined_call_operand.vmem [shape: f32[1,4], index: 2, kind: input, shape index: {}]   ;;  %s234_s3 = inlined_call_operand.vmem [shape: f32[30,4], index: 3, kind: output, shape index: {}]  }
   0x1   :  { %v21_v0 = vld [vmem:[%s231_s1 + $0x18] sm:$0xff]  ;;  %v20_v1 = vld [vmem:[%s231_s1 + $0x10] sm:$0xff]  ;;  %v19_v2 = vld [vmem:[%s231_s1 + $0x8] sm:$0xff] }
   0x2   :  { %150 = vmatprep.subr.mxu0 %v21_v0  ;;  %164 = vmatprep.subr.mxu1 %v21_v0  ;;  %v18_v3 = vld [vmem:[%s231_s1] sm:$0xff]  ;;  %v16_v5 = vld [vmem:[%s232_s0 + $0x10] sm:$0xff]  ;;  %v15_v6 = vld [vmem:[%s232_s0 + $0x8] sm:$0xff] }
   0x3   :  { %151 = vmatpush3.msra.mxu0 %v21_v0  ;;  %168 = vmatpush3.msra.mxu1 %v21_v0  ;;  %v14_v4 = vld [vmem:[%s232_s0] sm:$0xff]  ;;  %v17_v7 = vld [vmem:[%s232_s0 + $0x18] sm:$0x3f] }
   0x4   :  { %152 = vmatprep.subr.mxu0 %v20_v1  ;;  %165 = vmatprep.subr.mxu1 %v20_v1  ;;  %v137_v8 = vld [vmem:[%s233_s2] ss:$0 sm:$0xff] }
   0x5   :  { %153 = vmatpush3.msra.mxu0 %v20_v1  ;;  %169 = vmatpush3.msra.mxu1 %v20_v1 }
   0x6   :  { %154 = vmatprep.subr.mxu0 %v19_v2  ;;  %166 = vmatprep.subr.mxu1 %v19_v2 }
   0x7   :  { %155 = vmatpush3.msra.mxu0 %v19_v2  ;;  %170 = vmatpush3.msra.mxu1 %v19_v2 }
   0x8   :  { %156 = vmatprep.subr.mxu0 %v18_v3  ;;  %167 = vmatprep.subr.mxu1 %v18_v3 }
   0x9   :  { %157 = vmatpush3.msra.mxu0 %v18_v3  ;;  %171 = vmatpush3.msra.mxu1 %v18_v3 }
   0xa   :  { %158 = vmatprep.mubr.msk.f32.mxu0 %vm29_vm0, %v14_v4  ;;  %161 = vmatprep.mubr.msk.f32.mxu1 %vm29_vm0, %v16_v5 }
   0xb   :  { %159 = vmatmul.mubr.msk.f32.vlgmr.msra.gmra.mxu0 %vm29_vm0, %v15_v6  ;;  %162 = vmatmul.mubr.msk.f32.vlgmr.msra.gmra.mxu1 %vm29_vm0, %v17_v7 }
  0xcb   :  { %v160_v9 = vpop.f32.mrf.mxu0  ;;  %v163_v10 = vpop.f32.mrf.mxu1 }
  0xcc   :  { %v114_v11 = vadd.f32 %v160_v9, %v137_v8  ;;  %v124_v12 = vadd.f32 %v163_v10, %v137_v8 }
  0xcd   :  { %v108_v13 = vpop.f32.mrf.mxu0  ;;  %v118_v14 = vpop.f32.mrf.mxu1 }
  0xce   :  { %129 = vst.msk [vmem:[%s234_s3 + $0x8] sm:$0xff] %vm127_vm1, %v114_v11  ;;  %v109_v15 = vadd.f32 %v137_v8, %v108_v13  ;;  %v119_v16 = vadd.f32 %v137_v8, %v118_v14 }
  0xcf   :  { %132 = vst.msk [vmem:[%s234_s3 + $0x18] sm:$0x3f] %vm131_vm2, %v124_v12 }
  0xd0   :  { %128 = vst.msk [vmem:[%s234_s3] sm:$0xff] %vm127_vm1, %v109_v15  ;;  %130 = vst.msk [vmem:[%s234_s3 + $0x10] sm:$0xff] %vm127_vm1, %v119_v16 }

</bundles_post_ra>
